<compile_context>
chip_gen: v7x
topology: tpu7x:2x2x1
jax: 0.10.0
libtpu: 0.0.40
codegen_flags: <defaults>
</compile_context>

<pallas_src>
import functools

import jax
import jax.numpy as jnp
from jax import lax
from jax.experimental import pallas as pl
from jax.experimental.pallas import tpu as pltpu


# ----------------------------------------------------------------------------
# Tiling helper
# ----------------------------------------------------------------------------

def _tile(dim, pref, align):
    """Largest tile <= pref that divides `dim` and is a multiple of `align`;
    falls back to the full dim (always legal for a BlockSpec)."""
    t = (min(pref, dim) // align) * align
    while t >= align:
        if dim % t == 0:
            return t
        t -= align
    return dim


# ----------------------------------------------------------------------------
# Gate-stacked SRU matmul: x:[M,K] bf16, w:[G,K,N] bf16 -> U:[G,M,N] bf16
# ----------------------------------------------------------------------------

def _gated_matmul_kernel(x_ref, w_ref, o_ref, acc_ref):
    k = pl.program_id(3)

    @pl.when(k == 0)
    def _():
        acc_ref[...] = jnp.zeros_like(acc_ref)

    acc_ref[...] += jnp.dot(x_ref[...], w_ref[0],
                            preferred_element_type=jnp.float32)

    @pl.when(k == pl.num_programs(3) - 1)
    def _():
        o_ref[0] = acc_ref[...].astype(o_ref.dtype)


def sru_gates_matmul(x_flat, w_gates, *, tm_pref=256, tn_pref=512, tk_pref=512):
    G, K, N = w_gates.shape
    M = x_flat.shape[0]
    tm = _tile(M, tm_pref, 8)
    tn = _tile(N, tn_pref, 128)
    tk = _tile(K, tk_pref, 128)
    grid = (G, M // tm, N // tn, K // tk)
    return pl.pallas_call(
        _gated_matmul_kernel,
        out_shape=jax.ShapeDtypeStruct((G, M, N), jnp.bfloat16),
        grid_spec=pltpu.PrefetchScalarGridSpec(
            num_scalar_prefetch=0, grid=grid,
            in_specs=[pl.BlockSpec((tm, tk), lambda g, i, j, k: (i, k)),
                      pl.BlockSpec((1, tk, tn), lambda g, i, j, k: (g, k, j))],
            out_specs=pl.BlockSpec((1, tm, tn), lambda g, i, j, k: (g, i, j)),
            scratch_shapes=[pltpu.VMEM((tm, tn), jnp.float32)]),
        compiler_params=pltpu.CompilerParams(
            dimension_semantics=("parallel", "parallel", "parallel", "arbitrary"),
            vmem_limit_bytes=48 * 1024 * 1024),
    )(x_flat, w_gates)


# ----------------------------------------------------------------------------
# SRU recurrence: gridded over (batch, hidden); elementwise-only body
# ----------------------------------------------------------------------------

def _sru_recurrence_kernel(has_proj, *refs):
    """U = [u0 | f_pre | r_pre | (hw)] precomputed; per timestep:
         f_t = sigmoid(f_pre + bf),  r_t = sigmoid(r_pre + br)
         c_t = f_t*c_{t-1} + (1-f_t)*u0
         h_t = r_t*tanh(c_t) + (1-r_t)*(hw if dim_in != dim_out else x_t)
    """
    if has_proj:
        u_ref, bf_ref, br_ref, h_ref = refs
        x_ref = None
    else:
        u_ref, x_ref, bf_ref, br_ref, h_ref = refs
    T = u_ref.shape[1]
    tb, tn = u_ref.shape[2], u_ref.shape[3]
    bf = bf_ref[...].astype(jnp.float32)                      # [1, tn]
    br = br_ref[...].astype(jnp.float32)

    def step(t, c):
        u0 = u_ref[0, t].astype(jnp.float32)                  # [tb, tn]
        f = jax.nn.sigmoid(u_ref[1, t].astype(jnp.float32) + bf)
        r = jax.nn.sigmoid(u_ref[2, t].astype(jnp.float32) + br)
        c_new = f * c + (1.0 - f) * u0
        hw = (u_ref[3, t] if has_proj else x_ref[t]).astype(jnp.float32)
        h_ref[t] = (r * jnp.tanh(c_new) + (1.0 - r) * hw).astype(h_ref.dtype)
        return c_new

    unroll = T if T <= 8 else 8                               # capped unroll
    lax.fori_loop(0, T, step, jnp.zeros((tb, tn), jnp.float32), unroll=unroll)


def sru_layer(x_tbd, w_gates, bf, br, *, has_proj, n):
    """One SRU layer (use_tanh=True, eval mode). x_tbd:[T,B,nin] bf16."""
    T, B, nin = x_tbd.shape
    G = w_gates.shape[0]
    # Hoisted gate matmuls for all timesteps, gate-major bf16 output.
    u = sru_gates_matmul(x_tbd.reshape(T * B, nin), w_gates).reshape(G, T, B, n)

    tb = _tile(B, 8, 8)
    tn = _tile(n, 512, 128)
    in_specs = [pl.BlockSpec((G, T, tb, tn), lambda bi, ni: (0, 0, bi, ni))]
    operands = [u]
    if not has_proj:
        in_specs.append(pl.BlockSpec((T, tb, tn), lambda bi, ni: (0, bi, ni)))
        operands.append(x_tbd)
    in_specs += [pl.BlockSpec((1, tn), lambda bi, ni: (0, ni)),
                 pl.BlockSpec((1, tn), lambda bi, ni: (0, ni))]
    operands += [bf, br]

    return pl.pallas_call(
        functools.partial(_sru_recurrence_kernel, has_proj),
        out_shape=jax.ShapeDtypeStruct((T, B, n), jnp.bfloat16),
        grid_spec=pltpu.PrefetchScalarGridSpec(
            num_scalar_prefetch=0, grid=(B // tb, n // tn),
            in_specs=in_specs,
            out_specs=pl.BlockSpec((T, tb, tn), lambda bi, ni: (0, bi, ni))),
        compiler_params=pltpu.CompilerParams(
            dimension_semantics=("parallel", "parallel")),
    )(*operands)


# ----------------------------------------------------------------------------
# fc + L2 normalisation (joint fc and SruEmb.fc + torch.norm division)
# ----------------------------------------------------------------------------

def _fc_l2norm_kernel(x_ref, w_ref, b_ref, o_ref, acc_ref):
    k = pl.program_id(1)

    @pl.when(k == 0)
    def _():
        acc_ref[...] = jnp.zeros_like(acc_ref)

    acc_ref[...] += jnp.dot(x_ref[...], w_ref[...],
                            preferred_element_type=jnp.float32)

    @pl.when(k == pl.num_programs(1) - 1)
    def _():
        y = acc_ref[...] + b_ref[...]
        inv = lax.rsqrt(jnp.sum(y * y, axis=1, keepdims=True) + 1e-12)
        o_ref[...] = (y * inv).astype(o_ref.dtype)


def fc_l2norm(x_bf16, w, b):
    M, K = x_bf16.shape
    N = w.shape[1]
    tm = _tile(M, 256, 8)
    tk = _tile(K, 512, 128)
    return pl.pallas_call(
        _fc_l2norm_kernel,
        out_shape=jax.ShapeDtypeStruct((M, N), jnp.float32),
        grid_spec=pltpu.PrefetchScalarGridSpec(
            num_scalar_prefetch=0, grid=(M // tm, K // tk),
            in_specs=[pl.BlockSpec((tm, tk), lambda i, k: (i, k)),
                      pl.BlockSpec((tk, N), lambda i, k: (k, 0)),
                      pl.BlockSpec((1, N), lambda i, k: (0, 0))],
            out_specs=pl.BlockSpec((tm, N), lambda i, k: (i, 0)),
            scratch_shapes=[pltpu.VMEM((tm, N), jnp.float32)]),
        compiler_params=pltpu.CompilerParams(
            dimension_semantics=("parallel", "arbitrary")),
    )(x_bf16, w, b)


# ----------------------------------------------------------------------------
# Fused image branch: 1x1 spaConv + relu(fc1) + fc2 + softmax + pooling
# (Bt images per grid step; matmuls run on the flattened (Bt*P, .) slab)
# ----------------------------------------------------------------------------

def _img_branch_kernel(P, bt, feat_ref, wsc_ref, bsc_ref, w1_ref, w2_ref,
                       pool_ref, attn_ref):
    feat = feat_ref[...]                                                   # [Bt*P, D] bf16
    emb = jnp.dot(feat, wsc_ref[...],
                  preferred_element_type=jnp.float32) + bsc_ref[...]       # [Bt*P, E] f32
    h = jnp.maximum(jnp.dot(emb.astype(jnp.bfloat16), w1_ref[...],
                            preferred_element_type=jnp.float32), 0.0)      # [Bt*P, H]
    for bi in range(bt):                                   # small per-image epilogue
        emb_b = emb[bi * P:(bi + 1) * P]                                   # [P, E]
        h_b = h[bi * P:(bi + 1) * P]                                       # [P, H]
        scores = lax.dot_general(w2_ref[...], h_b.astype(jnp.bfloat16),
                                 dimension_numbers=(((1,), (1,)), ((), ())),
                                 preferred_element_type=jnp.float32)       # [K, P]
        m = jnp.max(scores, axis=1, keepdims=True)
        e = jnp.exp(scores - m)
        attn = e / jnp.sum(e, axis=1, keepdims=True)        # exact divide
        attn_ref[bi] = attn.astype(attn_ref.dtype)
        pool_ref[bi] = jnp.dot(attn, emb_b,
                               preferred_element_type=jnp.float32
                               ).astype(pool_ref.dtype)


def img_branch(feat_flat, wsc, bsc, w1, w2, *, B, P):
    D = feat_flat.shape[1]
    E = wsc.shape[1]
    H = w1.shape[1]
    K = w2.shape[0]
    bt = _tile(B, max(1, -(-256 // P)), 1)                  # fill ~256 MXU rows
    return pl.pallas_call(
        functools.partial(_img_branch_kernel, P, bt),
        out_shape=(jax.ShapeDtypeStruct((B, K, E), jnp.bfloat16),
                   jax.ShapeDtypeStruct((B, K, P), jnp.float32)),
        grid_spec=pltpu.PrefetchScalarGridSpec(
            num_scalar_prefetch=0, grid=(B // bt,),
            in_specs=[pl.BlockSpec((bt * P, D), lambda b: (b, 0)),
                      pl.BlockSpec((D, E), lambda b: (0, 0)),
                      pl.BlockSpec((1, E), lambda b: (0, 0)),
                      pl.BlockSpec((E, H), lambda b: (0, 0)),
                      pl.BlockSpec((K, H), lambda b: (0, 0))],
            out_specs=[pl.BlockSpec((bt, K, E), lambda b: (b, 0, 0)),
                       pl.BlockSpec((bt, K, P), lambda b: (b, 0, 0))]),
        compiler_params=pltpu.CompilerParams(
            dimension_semantics=("parallel",),
            vmem_limit_bytes=48 * 1024 * 1024),
    )(feat_flat, wsc, bsc, w1, w2)


# ----------------------------------------------------------------------------
# Caption attention pooling (tanh, length-masked softmax), Bt captions / step
# ----------------------------------------------------------------------------

def _cap_attn_kernel(T, bt, len_ref, x_ref, w1_ref, w2_ref, pool_ref, attn_ref):
    x = x_ref[...]                                                         # [Bt*T, E] bf16
    h = jnp.tanh(jnp.dot(x, w1_ref[...],
                         preferred_element_type=jnp.float32))              # [Bt*T, H]
    base = pl.program_id(0) * bt
    for j in range(bt):
        x_b = x[j * T:(j + 1) * T]                                         # [T, E]
        h_b = h[j * T:(j + 1) * T]                                         # [T, H]
        scores = lax.dot_general(w2_ref[...], h_b.astype(jnp.bfloat16),
                                 dimension_numbers=(((1,), (1,)), ((), ())),
                                 preferred_element_type=jnp.float32)       # [K, T]
        length = len_ref[base + j]
        pos = lax.broadcasted_iota(jnp.int32, scores.shape, 1)
        valid = pos < length
        scores = jnp.where(valid, scores, -1e30)            # finite sentinel
        m = jnp.max(scores, axis=1, keepdims=True)
        e = jnp.where(valid, jnp.exp(scores - m), 0.0)
        attn = e / (jnp.sum(e, axis=1, keepdims=True) + 1e-30)
        attn_ref[j] = attn.astype(attn_ref.dtype)
        pool_ref[j] = jnp.dot(attn, x_b.astype(jnp.float32),
                              preferred_element_type=jnp.float32
                              ).astype(pool_ref.dtype)


def cap_attn_pool(x_flat, w1, w2, lengths, *, B, T):
    E = x_flat.shape[1]
    H = w1.shape[1]
    K = w2.shape[0]
    bt = _tile(B, max(1, -(-256 // T)), 1)
    return pl.pallas_call(
        functools.partial(_cap_attn_kernel, T, bt),
        out_shape=(jax.ShapeDtypeStruct((B, K, E), jnp.bfloat16),
                   jax.ShapeDtypeStruct((B, K, T), jnp.float32)),
        grid_spec=pltpu.PrefetchScalarGridSpec(
            num_scalar_prefetch=1, grid=(B // bt,),
            in_specs=[pl.BlockSpec((bt * T, E), lambda b, lens: (b, 0)),
                      pl.BlockSpec((E, H), lambda b, lens: (0, 0)),
                      pl.BlockSpec((K, H), lambda b, lens: (0, 0))],
            out_specs=[pl.BlockSpec((bt, K, E), lambda b, lens: (b, 0, 0)),
                       pl.BlockSpec((bt, K, T), lambda b, lens: (b, 0, 0))]),
        compiler_params=pltpu.CompilerParams(dimension_semantics=("parallel",)),
    )(lengths, x_flat, w1, w2)


# ----------------------------------------------------------------------------
# Parameters (deterministic, synthetic) and forward glue
# ----------------------------------------------------------------------------

def init_params(key, *, dimemb, attn_hidden, attn_hop, img_channels, word_dim,
                num_sru_layers):
    E, H, K = dimemb, attn_hidden, attn_hop
    ks = iter(jax.random.split(key, 64))

    def w(shape, fan_in, dtype=jnp.bfloat16):
        v = jax.random.normal(next(ks), shape, jnp.float32) / jnp.sqrt(
            jnp.float32(fan_in))
        return v.astype(dtype)

    params = {}
    # img_embedding.spaConv: Conv2d(D, E, 1) -> matmul weight [D, E], bias [1, E]
    params["spaconv_w"] = w((img_channels, E), img_channels)
    params["spaconv_b"] = w((1, E), E, jnp.float32)
    # img_embedding.fc1/fc2 (no bias): fc1 transposed [E, H], fc2 torch layout [K, H]
    params["img_fc1_w"] = w((E, H), E)
    params["img_fc2_w"] = w((K, H), H)
    # joint_embedding.fc: Linear(E*K, E), stored transposed
    params["joint_fc_w"] = w((E * K, E), E * K)
    params["joint_fc_b"] = w((1, E), E, jnp.float32)
    # SruEmb.rnn: stack of SRU layers; gate weights stacked gate-major [G, nin, E]
    layers = []
    nin = word_dim
    for _ in range(num_sru_layers):
        has_proj = nin != E
        G = 4 if has_proj else 3
        gates = jnp.stack([w((nin, E), nin, jnp.float32) for _ in range(G)], axis=0)
        layers.append({"w_gates": gates.astype(jnp.bfloat16),
                       "has_proj": has_proj,
                       "bf": jnp.zeros((1, E), jnp.float32),
                       "br": jnp.zeros((1, E), jnp.float32)})
        nin = E
    params["sru_layers"] = layers
    # SruEmb.ws1 (E->H, no bias) transposed [E,H]; ws2 (H->K, no bias) [K,H]
    params["ws1_w"] = w((E, H), E)
    params["ws2_w"] = w((K, H), H)
    # SruEmb.fc: Linear(E*K, E, bias=True), stored transposed
    params["cap_fc_w"] = w((E * K, E), E * K)
    params["cap_fc_b"] = w((1, E), E, jnp.float32)
    return params


def joint_embedding_forward(params, imgs, caps):
    # ---------------- image branch (img_embedding, fused) ----------------
    B, D, Hf, Wf = imgs.shape
    P = Hf * Wf
    E = params["joint_fc_b"].shape[1]
    # NCHW feature map -> position-major [B*P, D], bf16 once (halves HBM->VMEM DMA)
    feat = jnp.transpose(imgs, (0, 2, 3, 1)).reshape(B * P, D).astype(jnp.bfloat16)
    img_pool, img_attn = img_branch(feat, params["spaconv_w"], params["spaconv_b"],
                                    params["img_fc1_w"], params["img_fc2_w"],
                                    B=B, P=P)
    x_imgs = fc_l2norm(img_pool.reshape(B, -1),
                       params["joint_fc_w"], params["joint_fc_b"])

    # ---------------- caption branch (SruEmb) ----------------
    Bc, T, _ = caps.shape
    # _process_lengths: matches the reference only if no real token embedding has
    # component 0 exactly equal to 0.0 mid-sequence.
    lengths = (T - jnp.sum((caps[:, :, 0] == 0).astype(jnp.int32),
                           axis=1)).astype(jnp.int32)
    x = jnp.transpose(caps, (1, 0, 2)).astype(jnp.bfloat16)   # [T, B, word_dim]
    for lp in params["sru_layers"]:
        x = sru_layer(x, lp["w_gates"], lp["bf"], lp["br"],
                      has_proj=lp["has_proj"], n=E)           # bf16 [T, B, E]
    h_flat = jnp.transpose(x, (1, 0, 2)).reshape(Bc * T, E)   # [B*T, E] bf16
    cap_pool, txt_attn = cap_attn_pool(h_flat, params["ws1_w"], params["ws2_w"],
                                       lengths, B=Bc, T=T)
    x_caps = fc_l2norm(cap_pool.reshape(Bc, -1),
                       params["cap_fc_w"], params["cap_fc_b"])
    return x_imgs, x_caps, img_attn, txt_attn


if __name__ == "__main__":
    key = jax.random.PRNGKey(0)
    # args: dimemb=32 (2400 in original), attn_hidden=16, attn_hop=4, sru=2
    DIMEMB, ATTN_HIDDEN, ATTN_HOP, NUM_SRU = 32, 16, 4, 2
    B, D, HF, WF = 2, 64, 4, 4          # image feature map (D=2048 in original)
    T, WORD_DIM = 8, 620                # caption length / word embedding dim

    k_param, k_img, k_cap = jax.random.split(key, 3)
    params = init_params(k_param, dimemb=DIMEMB, attn_hidden=ATTN_HIDDEN,
                         attn_hop=ATTN_HOP, img_channels=D, word_dim=WORD_DIM,
                         num_sru_layers=NUM_SRU)

    imgs = jax.random.normal(k_img, (B, D, HF, WF), jnp.float32)
    caps = jax.random.normal(k_cap, (B, T, WORD_DIM), jnp.float32)
    caps = caps.at[1, 6:, :].set(0.0)   # zero-pad last 2 steps of sample 1 -> length 6

    x_imgs, x_caps, img_attn, txt_attn = joint_embedding_forward(params, imgs, caps)
    jax.block_until_ready((x_imgs, x_caps, img_attn, txt_attn))

    assert x_imgs.shape == (B, DIMEMB)
    assert x_caps.shape == (B, DIMEMB)
    assert img_attn.shape == (B, ATTN_HOP, HF * WF)
    assert txt_attn.shape == (B, ATTN_HOP, T)
    assert bool(jnp.all(jnp.isfinite(x_imgs))) and bool(jnp.all(jnp.isfinite(x_caps)))
    print("KERNEL_OK")
</pallas_src>

<mosaic_0001>
module attributes {stable_mosaic.version = 11 : i64} {
  func.func @_img_branch_kernel(%arg0: i32, %arg1: memref<32x64xbf16, #tpu.memory_space<vmem>>, %arg2: memref<64x32xbf16, #tpu.memory_space<vmem>>, %arg3: memref<1x32xf32, #tpu.memory_space<vmem>>, %arg4: memref<32x16xbf16, #tpu.memory_space<vmem>>, %arg5: memref<4x16xbf16, #tpu.memory_space<vmem>>, %arg6: memref<2x4x32xbf16, #tpu.memory_space<vmem>>, %arg7: memref<2x4x16xf32, #tpu.memory_space<vmem>>) attributes {dimension_semantics = [#tpu.dimension_semantics<parallel>], iteration_bounds = array<i64: 1>, scalar_prefetch = 0 : i64, scratch_operands = 0 : i64, tpu.core_type = #tpu.core_type<tc>, window_params = [{transform_indices = @transform_0, window_bounds = array<i64: 32, 64>}, {pipeline_mode = #tpu.pipeline_mode<synchronous>, transform_indices = @transform_1, window_bounds = array<i64: 64, 32>}, {pipeline_mode = #tpu.pipeline_mode<synchronous>, transform_indices = @transform_2, window_bounds = array<i64: 1, 32>}, {pipeline_mode = #tpu.pipeline_mode<synchronous>, transform_indices = @transform_3, window_bounds = array<i64: 32, 16>}, {pipeline_mode = #tpu.pipeline_mode<synchronous>, transform_indices = @transform_4, window_bounds = array<i64: 4, 16>}, {transform_indices = @transform_5, window_bounds = array<i64: 2, 4, 32>}, {transform_indices = @transform_6, window_bounds = array<i64: 2, 4, 16>}]} {
    %c0 = arith.constant 0 : index
    %c0_0 = arith.constant 0 : index
    %0 = vector.load %arg1[%c0, %c0_0] : memref<32x64xbf16, #tpu.memory_space<vmem>>, vector<32x64xbf16>
    %c0_1 = arith.constant 0 : index
    %c0_2 = arith.constant 0 : index
    %1 = vector.load %arg2[%c0_1, %c0_2] : memref<64x32xbf16, #tpu.memory_space<vmem>>, vector<64x32xbf16>
    %cst = arith.constant dense<0.000000e+00> : vector<32x32xf32>
    %2 = tpu.matmul %0, %1, %cst {dimension_numbers = #tpu.dot_dimension_numbers<[1], [0], [0], [1], [0, 0, 1, 1], [], []>} : vector<32x64xbf16>, vector<64x32xbf16>, vector<32x32xf32> -> vector<32x32xf32>
    %c0_3 = arith.constant 0 : index
    %c0_4 = arith.constant 0 : index
    %3 = vector.load %arg3[%c0_3, %c0_4] : memref<1x32xf32, #tpu.memory_space<vmem>>, vector<1x32xf32>
    %4 = vector.broadcast %3 : vector<1x32xf32> to vector<32x32xf32>
    %5 = arith.addf %2, %4 : vector<32x32xf32>
    %6 = arith.truncf %5 : vector<32x32xf32> to vector<32x32xbf16>
    %c0_5 = arith.constant 0 : index
    %c0_6 = arith.constant 0 : index
    %7 = vector.load %arg4[%c0_5, %c0_6] : memref<32x16xbf16, #tpu.memory_space<vmem>>, vector<32x16xbf16>
    %cst_7 = arith.constant dense<0.000000e+00> : vector<32x16xf32>
    %8 = tpu.matmul %6, %7, %cst_7 {dimension_numbers = #tpu.dot_dimension_numbers<[1], [0], [0], [1], [0, 0, 1, 1], [], []>} : vector<32x32xbf16>, vector<32x16xbf16>, vector<32x16xf32> -> vector<32x16xf32>
    %cst_8 = arith.constant 0.000000e+00 : f32
    %9 = vector.broadcast %cst_8 : f32 to vector<32x16xf32>
    %10 = arith.maximumf %8, %9 : vector<32x16xf32>
    %11 = vector.extract_strided_slice %5 {offsets = [0, 0], sizes = [16, 32], strides = [1, 1]} : vector<32x32xf32> to vector<16x32xf32>
    %12 = vector.extract_strided_slice %10 {offsets = [0, 0], sizes = [16, 16], strides = [1, 1]} : vector<32x16xf32> to vector<16x16xf32>
    %c0_9 = arith.constant 0 : index
    %c0_10 = arith.constant 0 : index
    %13 = vector.load %arg5[%c0_9, %c0_10] : memref<4x16xbf16, #tpu.memory_space<vmem>>, vector<4x16xbf16>
    %14 = arith.truncf %12 : vector<16x16xf32> to vector<16x16xbf16>
    %cst_11 = arith.constant dense<0.000000e+00> : vector<4x16xf32>
    %15 = tpu.matmul %13, %14, %cst_11 {dimension_numbers = #tpu.dot_dimension_numbers<[1], [1], [0], [0], [0, 0, 1, 0], [], []>} : vector<4x16xbf16>, vector<16x16xbf16>, vector<4x16xf32> -> vector<4x16xf32>
    %cst_12 = arith.constant dense<0xFF800000> : vector<4xf32>
    %16 = vector.multi_reduction <maximumf>, %15, %cst_12 [1] : vector<4x16xf32> to vector<4xf32>
    %17 = vector.shape_cast %16 : vector<4xf32> to vector<4x1xf32>
    %18 = vector.broadcast %17 : vector<4x1xf32> to vector<4x16xf32>
    %19 = arith.subf %15, %18 : vector<4x16xf32>
    %20 = math.exp %19 : vector<4x16xf32>
    %cst_13 = arith.constant dense<0.000000e+00> : vector<4xf32>
    %21 = vector.multi_reduction <add>, %20, %cst_13 [1] : vector<4x16xf32> to vector<4xf32>
    %22 = vector.shape_cast %21 : vector<4xf32> to vector<4x1xf32>
    %23 = vector.broadcast %22 : vector<4x1xf32> to vector<4x16xf32>
    %24 = arith.divf %20, %23 : vector<4x16xf32>
    %c0_14 = arith.constant 0 : index
    %c0_15 = arith.constant 0 : index
    %c0_16 = arith.constant 0 : index
    %25 = vector.load %arg7[%c0_14, %c0_15, %c0_16] : memref<2x4x16xf32, #tpu.memory_space<vmem>>, vector<1x4x16xf32>
    %26 = vector.shape_cast %25 : vector<1x4x16xf32> to vector<4x16xf32>
    %27 = vector.shape_cast %24 : vector<4x16xf32> to vector<1x4x16xf32>
    tpu.vector_store %arg7[%c0_14, %c0_15, %c0_16], %27 {strides = array<i32>} : memref<2x4x16xf32, #tpu.memory_space<vmem>>, vector<1x4x16xf32>,
    %cst_17 = arith.constant dense<0.000000e+00> : vector<4x32xf32>
    %28 = tpu.matmul %24, %11, %cst_17 {dimension_numbers = #tpu.dot_dimension_numbers<[1], [0], [0], [1], [0, 0, 1, 1], [], []>} : vector<4x16xf32>, vector<16x32xf32>, vector<4x32xf32> -> vector<4x32xf32>
    %29 = arith.truncf %28 : vector<4x32xf32> to vector<4x32xbf16>
    %c0_18 = arith.constant 0 : index
    %c0_19 = arith.constant 0 : index
    %c0_20 = arith.constant 0 : index
    %30 = vector.load %arg6[%c0_18, %c0_19, %c0_20] : memref<2x4x32xbf16, #tpu.memory_space<vmem>>, vector<1x4x32xbf16>
    %31 = vector.shape_cast %30 : vector<1x4x32xbf16> to vector<4x32xbf16>
    %32 = vector.shape_cast %29 : vector<4x32xbf16> to vector<1x4x32xbf16>
    tpu.vector_store %arg6[%c0_18, %c0_19, %c0_20], %32 {strides = array<i32>} : memref<2x4x32xbf16, #tpu.memory_space<vmem>>, vector<1x4x32xbf16>,
    %33 = vector.extract_strided_slice %5 {offsets = [16, 0], sizes = [16, 32], strides = [1, 1]} : vector<32x32xf32> to vector<16x32xf32>
    %34 = vector.extract_strided_slice %10 {offsets = [16, 0], sizes = [16, 16], strides = [1, 1]} : vector<32x16xf32> to vector<16x16xf32>
    %c0_21 = arith.constant 0 : index
    %c0_22 = arith.constant 0 : index
    %35 = vector.load %arg5[%c0_21, %c0_22] : memref<4x16xbf16, #tpu.memory_space<vmem>>, vector<4x16xbf16>
    %36 = arith.truncf %34 : vector<16x16xf32> to vector<16x16xbf16>
    %cst_23 = arith.constant dense<0.000000e+00> : vector<4x16xf32>
    %37 = tpu.matmul %35, %36, %cst_23 {dimension_numbers = #tpu.dot_dimension_numbers<[1], [1], [0], [0], [0, 0, 1, 0], [], []>} : vector<4x16xbf16>, vector<16x16xbf16>, vector<4x16xf32> -> vector<4x16xf32>
    %cst_24 = arith.constant dense<0xFF800000> : vector<4xf32>
    %38 = vector.multi_reduction <maximumf>, %37, %cst_24 [1] : vector<4x16xf32> to vector<4xf32>
    %39 = vector.shape_cast %38 : vector<4xf32> to vector<4x1xf32>
    %40 = vector.broadcast %39 : vector<4x1xf32> to vector<4x16xf32>
    %41 = arith.subf %37, %40 : vector<4x16xf32>
    %42 = math.exp %41 : vector<4x16xf32>
    %cst_25 = arith.constant dense<0.000000e+00> : vector<4xf32>
    %43 = vector.multi_reduction <add>, %42, %cst_25 [1] : vector<4x16xf32> to vector<4xf32>
    %44 = vector.shape_cast %43 : vector<4xf32> to vector<4x1xf32>
    %45 = vector.broadcast %44 : vector<4x1xf32> to vector<4x16xf32>
    %46 = arith.divf %42, %45 : vector<4x16xf32>
    %c1 = arith.constant 1 : index
    %c0_26 = arith.constant 0 : index
    %c0_27 = arith.constant 0 : index
    %47 = vector.load %arg7[%c1, %c0_26, %c0_27] : memref<2x4x16xf32, #tpu.memory_space<vmem>>, vector<1x4x16xf32>
    %48 = vector.shape_cast %47 : vector<1x4x16xf32> to vector<4x16xf32>
    %49 = vector.shape_cast %46 : vector<4x16xf32> to vector<1x4x16xf32>
    tpu.vector_store %arg7[%c1, %c0_26, %c0_27], %49 {strides = array<i32>} : memref<2x4x16xf32, #tpu.memory_space<vmem>>, vector<1x4x16xf32>,
    %cst_28 = arith.constant dense<0.000000e+00> : vector<4x32xf32>
    %50 = tpu.matmul %46, %33, %cst_28 {dimension_numbers = #tpu.dot_dimension_numbers<[1], [0], [0], [1], [0, 0, 1, 1], [], []>} : vector<4x16xf32>, vector<16x32xf32>, vector<4x32xf32> -> vector<4x32xf32>
    %51 = arith.truncf %50 : vector<4x32xf32> to vector<4x32xbf16>
    %c1_29 = arith.constant 1 : index
    %c0_30 = arith.constant 0 : index
    %c0_31 = arith.constant 0 : index
    %52 = vector.load %arg6[%c1_29, %c0_30, %c0_31] : memref<2x4x32xbf16, #tpu.memory_space<vmem>>, vector<1x4x32xbf16>
    %53 = vector.shape_cast %52 : vector<1x4x32xbf16> to vector<4x32xbf16>
    %54 = vector.shape_cast %51 : vector<4x32xbf16> to vector<1x4x32xbf16>
    tpu.vector_store %arg6[%c1_29, %c0_30, %c0_31], %54 {strides = array<i32>} : memref<2x4x32xbf16, #tpu.memory_space<vmem>>, vector<1x4x32xbf16>,
    return
  }
  func.func @transform_0(%arg0: i32) -> (i32, i32) {
    %c0_i32 = arith.constant 0 : i32
    %c0_i32_0 = arith.constant 0 : i32
    return %arg0, %c0_i32 : i32, i32
  }
  func.func @transform_1(%arg0: i32) -> (i32, i32) {
    %c0_i32 = arith.constant 0 : i32
    %c0_i32_0 = arith.constant 0 : i32
    %c0_i32_1 = arith.constant 0 : i32
    return %c0_i32, %c0_i32_0 : i32, i32
  }
  func.func @transform_2(%arg0: i32) -> (i32, i32) {
    %c0_i32 = arith.constant 0 : i32
    %c0_i32_0 = arith.constant 0 : i32
    %c0_i32_1 = arith.constant 0 : i32
    return %c0_i32, %c0_i32_0 : i32, i32
  }
  func.func @transform_3(%arg0: i32) -> (i32, i32) {
    %c0_i32 = arith.constant 0 : i32
    %c0_i32_0 = arith.constant 0 : i32
    %c0_i32_1 = arith.constant 0 : i32
    return %c0_i32, %c0_i32_0 : i32, i32
  }
  func.func @transform_4(%arg0: i32) -> (i32, i32) {
    %c0_i32 = arith.constant 0 : i32
    %c0_i32_0 = arith.constant 0 : i32
    %c0_i32_1 = arith.constant 0 : i32
    return %c0_i32, %c0_i32_0 : i32, i32
  }
  func.func @transform_5(%arg0: i32) -> (i32, i32, i32) {
    %c0_i32 = arith.constant 0 : i32
    %c0_i32_0 = arith.constant 0 : i32
    %c0_i32_1 = arith.constant 0 : i32
    return %arg0, %c0_i32, %c0_i32_0 : i32, i32, i32
  }
  func.func @transform_6(%arg0: i32) -> (i32, i32, i32) {
    %c0_i32 = arith.constant 0 : i32
    %c0_i32_0 = arith.constant 0 : i32
    %c0_i32_1 = arith.constant 0 : i32
    return %arg0, %c0_i32, %c0_i32_0 : i32, i32, i32
  }
}

</mosaic_0001>

<bundles_post_ra>
// kernel: tpu_custom_call.1
= control target key start
LH: loop header
LB: loop body
LE: loop exit
PB: predicated region body
PF: predicated region fallthrough
CT: control target
= control target key end

     0   :  { %12 = vsyncpa [#allocation3], 0  ;;  %vm78_vm0 = vcmask 523264   ;;  %s802_s0 = inlined_call_operand.vmem [shape: bf16[32,64], index: 0, kind: input, shape index: {}]   ;;  %s803_s1 = inlined_call_operand.vmem [shape: bf16[64,32], index: 1, kind: input, shape index: {}]   ;;  %s804_s2 = inlined_call_operand.vmem [shape: f32[1,32], index: 2, kind: input, shape index: {}]   ;;  %s805_s3 = inlined_call_operand.vmem [shape: bf16[32,16], index: 3, kind: input, shape index: {}]   ;;  %s806_s4 = inlined_call_operand.vmem [shape: bf16[4,16], index: 4, kind: input, shape index: {}]   ;;  %s807_s5 = inlined_call_operand.hbm [shape: bf16[2,4,32], index: 5, kind: output, shape index: {0}]   ;;  %s808_s6 = inlined_call_operand.hbm [shape: f32[2,4,16], index: 6, kind: output, shape index: {1}]  }
   0x1   :  { %v617_v0 = vld [vmem:[%s803_s1] sm:$0xff]   ;;  %v618_v1 = vld [vmem:[%s803_s1 + $0x8] sm:$0xff]   ;;  %v619_v2 = vld [vmem:[%s803_s1 + $0x10] sm:$0xff]  }
   0x2   :  { %556 = vmatprep.subr.bf16.mxu0 %v617_v0  ;;  %v621_v3 = vld [vmem:[%s802_s0] sm:$0xff]  }
   0x3   :  { %557 = vmatpush3.bf16.msra.mxu0 %v617_v0  ;;  %564 = vmatprep.mubr.msk.bf16.mxu0 %vm78_vm0, %v621_v3 }
   0x4   :  { %558 = vmatprep.subr.bf16.mxu0 %v618_v1 }
   0x7   :  { %559 = vmatpush3.bf16.msra.mxu0 %v618_v1 }
   0x8   :  { %13 = vsyncpa [#allocation5], 0  ;;  %560 = vmatprep.subr.bf16.mxu0 %v619_v2  ;;  %v620_v4 = vld [vmem:[%s803_s1 + $0x18] sm:$0xff]   ;;  %v622_v5 = vld [vmem:[%s802_s0 + $0x8] sm:$0xff]   ;;  %v681_v8 = vmov 0.0|0.0   ;;  %vm152_vm1 = vcmask 261120  }
   0x9   :  { %v623_v6 = vld [vmem:[%s805_s3] sm:$0xff]   ;;  %v624_v7 = vld [vmem:[%s805_s3 + $0x8] sm:$0xff]   ;;  %v682_v20 = vmov 0.0   ;;  %vm683_vm2 = vmmov 0   ;;  %vm214_vm3 = vcmask 130048   ;;  %vm261_vm4 = vcmask 125952  }
   0xa   :  { %568 = vmatprep.subr.bf16.mxu1 %v623_v6  ;;  %v519_v10 = vld [vmem:[%s804_s2] ss:$0 sm:$0xff] }
   0xb   :  { %561 = vmatpush3.bf16.msra.mxu0 %v619_v2  ;;  %569 = vmatpush3.bf16.msra.mxu1 %v623_v6  ;;  %v212_v32 = vld [vmem:[%s806_s4] sm:$0x3] }
   0xc   :  { %562 = vmatprep.subr.bf16.mxu0 %v620_v4  ;;  %570 = vmatprep.subr.bf16.mxu1 %v624_v7  ;;  %v350_v34 = vld [vmem:[%s806_s4] sm:$0x3]  ;;  %s684_s4 = smov [#allocation4]  }
   0xd   :  { %s504_s15 = sshll.u32 %s684_s4, 4  ;;  %s505_s15 = int_to_ptr.vmem [resolvable:$true] %s504_s15 }
   0xe   :  { %s633_s16 = scalar_lea.vmem %s505_s15, 128  ;;  %p638_p1 = scmp.lt.s32.totalorder %s505_s15, %s505_s15 }
   0xf   :  { %563 = vmatpush3.bf16.msra.mxu0 %v620_v4  ;;  %571 = vmatpush3.bf16.msra.mxu1 %v624_v7  ;;  %p634_p0 = scmp.ne.s32.totalorder %s505_s15, %s633_s16  ;;  %p639_p2 = scmp.lt.s32.totalorder %s633_s16, %s633_s16 }
  0x10   :  { %602 = vmatprep.subr.bf16.mxu0 %v681_v8  ;;  %576 = vmatprep.subr.bf16.mxu1 %v682_v20 }
  0x11   :  { %p640_p3 = por %p639_p2, %p638_p1 }
  0x12   :  { %565 = vmatmul.mubr.msk.bf16.vlgmr.msra.gmra.mrb[0].mxu0 %vm78_vm0, %v622_v5 }
  0x13   :  { %586 = vmatprep.mubr.msk.f32.mxu0 %vm683_vm2, %v682_v20  ;;  %p641_p4 = pnand %p640_p3, %p634_p0 }
  0xe5   :  { %v566_v9 = vpop.f32.mrb[0].mxu0 }
  0xe6   :  { %v119_v11 = vpop.f32.mrb[1].mxu0  ;;  %v128_v13 = vadd.f32 %v566_v9, %v519_v10 }
  0xe7   :  { %v567_v12 = vpop.f32.mrb[2].mxu0  ;;  %v120_v16 = vadd.f32 %v519_v10, %v119_v11 }
  0xe8   :  { %v131_v14 = vadd.f32 %v567_v12, %v519_v10  ;;  %v122_v15 = vpop.f32.mrb[3].mxu0 }
  0xe9   :  { %v123_v17 = vadd.f32 %v519_v10, %v122_v15 }
  0xea   :  { %v752_v18 = vpack.c.bf16 %v131_v14, %v128_v13 }
  0xeb   :  { %v134_v19 = vpack.c.bf16 %v123_v17, %v120_v16 }
  0xed   :  { %572 = vmatprep.mubr.msk.bf16.mxu1 %vm152_vm1, %v134_v19  ;;  %604 = vmatpush3.bf16.msra.mxu0 %v134_v19 }
  0xee   :  { %573 = vmatmul.mubr.msk.bf16.vlgmr.msra.gmra.mrb[0].mxu1 %vm152_vm1, %v752_v18  ;;  %605 = vmatprep.subr.bf16.mxu0 %v681_v8 }
  0xef   :  { %578 = vmatprep.mubr.msk.bf16.mxu1 %vm683_vm2, %v682_v20 }
 0x1c1   :  { %v574_v21 = vpop.f32.mrb[0].mxu1 }
 0x1c2   :  { %v193_v22 = vpop.f32.mrb[1].mxu1  ;;  %v210_v24 = vmax.f32 %v574_v21, 0.0 }
 0x1c3   :  { %v575_v23 = vpop.f32.mrb[2].mxu1  ;;  %v208_v27 = vmax.f32 %v193_v22, 0.0 }
 0x1c4   :  { %v211_v25 = vmax.f32 %v575_v23, 0.0  ;;  %v196_v26 = vpop.f32.mrb[3].mxu1 }
 0x1c5   :  { %v209_v28 = vmax.f32 %v196_v26, 0.0 }
 0x1c6   :  { %v351_v29 = vpack.c.bf16 %v211_v25, %v210_v24 }
 0x1c7   :  { %v213_v30 = vpack.c.bf16 %v209_v28, %v208_v27 }
 0x1c8   :  { %v356_v33 = vsel %vm214_vm3, %v351_v29, 0 }
 0x1c9   :  { %v219_v31 = vsel %vm214_vm3, %v213_v30, 0 }
 0x1ca   :  { %577 = vmatpush3.bf16.xpose.msra.mxu1 %v219_v31 }
 0x1cb   :  { %589 = vmatprep.subr.bf16.mxu1 %v682_v20 }
 0x1d1   :  { %579 = vmatmul.mubr.msk.bf16.vlgmr.msra.gmra.mrb[4].mxu1 %vm214_vm3, %v212_v32 }
 0x1d2   :  { %590 = vmatpush3.bf16.xpose.msra.mxu1 %v356_v33  ;;  %591 = vmatprep.mubr.msk.bf16.mxu1 %vm683_vm2, %v682_v20 }
 0x1d9   :  { %592 = vmatmul.mubr.msk.bf16.vlgmr.msra.gmra.mrb[8].mxu1 %vm214_vm3, %v350_v34 }
 0x2a4   :  { %v255_v35 = vpop.f32.mrb[4].mxu1 }
 0x2a5   :  { %v580_v36 = vpop.f32.mrb[5].mxu1  ;;  %v262_v37 = vsel %vm261_vm4, %v255_v35, -inf }
 0x2a6   :  { %263 = vmax.xlane.f32.xlu0 %v262_v37  ;;  %v258_v38 = vpop.f32.mrb[6].mxu1 }
 0x2a7   :  { %v581_v39 = vpop.f32.mrb[7].mxu1 }
 0x2ac   :  { %v392_v40 = vpop.f32.mrb[8].mxu1 }
 0x2ad   :  { %v593_v41 = vpop.f32.mrb[9].mxu1  ;;  %v398_v42 = vsel %vm261_vm4, %v392_v40, -inf }
 0x2ae   :  { %399 = vmax.xlane.f32.xlu0 %v398_v42  ;;  %v395_v43 = vpop.f32.mrb[10].mxu1 }
 0x2af   :  { %v594_v44 = vpop.f32.mrb[11].mxu1 }
 0x333   :  { %v264_v45 = vpop.xlane.xlu0 %263 }
 0x334   :  { %v265_v46 = vsub.f32 %v255_v35, %v264_v45 }
 0x336   :  { %v266_v47 = vmul.f32 1.442695, %v265_v46 }
 0x338   :  { %625 = vpow2.f32 %v266_v47 }
 0x33b   :  { %v400_v48 = vpop.xlane.xlu0 %399 }
 0x33c   :  { %v401_v49 = vsub.f32 %v392_v40, %v400_v48 }
 0x33e   :  { %v402_v50 = vmul.f32 1.442695, %v401_v49 }
 0x340   :  { %627 = vpow2.f32 %v402_v50 }
 0x342   :  { %v626_v51 = vpop.eup %625 }
 0x343   :  { %v268_v52 = vsel %vm261_vm4, %v626_v51, 0.0 }
 0x344   :  { %269 = vadd.xlane.f32.xlu1 %v268_v52 }
 0x34a   :  { %v628_v53 = vpop.eup %627 }
 0x34b   :  { %v404_v54 = vsel %vm261_vm4, %v628_v53, 0.0 }
 0x34c   :  { %405 = vadd.xlane.f32.xlu1 %v404_v54 }
 0x3d1   :  { %v270_v55 = vpop.xlane.xlu1 %269 }
 0x3d2   :  { %629 = vrcp.f32 %v270_v55 }
 0x3d9   :  { %v406_v56 = vpop.xlane.xlu1 %405 }
 0x3da   :  { %631 = vrcp.f32 %v406_v56 }
 0x3dc   :  { %v630_v57 = vpop.eup %629 }
 0x3dd   :  { %v272_v58 = vmul.f32 %v630_v57, %v626_v51 }
 0x3df   :  { %273 = vst.msk [vmem:[#allocation4] sm:$0xf] %vm261_vm4, %v272_v58  ;;  %587 = vmatmul.mubr.msk.f32.vlgmr.msra.gmra.mrb[4].mxu0 %vm214_vm3, %v272_v58 }
 0x3e0   :  { %607 = vmatpush3.bf16.msra.mxu0 %v752_v18  ;;  %599 = vmatprep.mubr.msk.f32.mxu0 %vm683_vm2, %v682_v20 }
 0x3e4   :  { %v632_v59 = vpop.eup %631 }
 0x3e5   :  { %v408_v60 = vmul.f32 %v632_v59, %v628_v53 }
 0x3e7   :  { %410 = vst.msk [vmem:[#allocation4 + $0x4] sm:$0xf] %vm261_vm4, %v408_v60  ;;  %600 = vmatmul.mubr.msk.f32.vlgmr.msra.gmra.mrb[6].mxu0 %vm214_vm3, %v408_v60 }
 0x3e8   :  { %644 = shalt.err (!%p641_p4)
}
 0x3e9   :  { %s645_s19 = scalar_lea.hbm %s808_s6, 128 }
 0x3ea   :  { %p646_p5 = scmp.ne.s32.totalorder %s808_s6, %s645_s19  ;;  %p649_p6 = scmp.lt.u32.totalorder %s645_s19, %s808_s6 }
 0x3ec   :  { %p651_p7 = pnand %p649_p6, %p646_p5 }
 0x3ee   :  { %654 = shalt.err (!%p651_p7)
}
 0x3ef   :  { %s685_s24 = smov 64   ;;  %s686_s25 = smov 4   ;;  %vm348_vm5 = vcmask 254976  }
 0x3f0   :  { %510 = dma.vmem_to_hbm [thread:$0]  %s505_s15, 128, %s808_s6, [#allocation5], %s685_s24, %s685_s24, %s686_s25  }
 0x3f1   :  { %s687_s28 = smov [#allocation2]  }
 0x3f2   :  { %s492_s29 = sshll.u32 %s687_s28, 4  ;;  %s493_s29 = int_to_ptr.vmem [resolvable:$true] %s492_s29 }
 0x3f3   :  { %s655_s30 = scalar_lea.vmem %s493_s29, 64  ;;  %p660_p9 = scmp.lt.s32.totalorder %s493_s29, %s493_s29 }
 0x3f4   :  { %p656_p8 = scmp.ne.s32.totalorder %s493_s29, %s655_s30  ;;  %p661_p10 = scmp.lt.s32.totalorder %s655_s30, %s655_s30 }
 0x3f6   :  { %p662_p11 = por %p661_p10, %p660_p9 }
 0x3f8   :  { %p663_p12 = pnand %p662_p11, %p656_p8 }
 0x4b2   :  { %v343_v61 = vpop.f32.mrb[4].mxu0 }
 0x4b3   :  { %v347_v62 = vpack.c.bf16 %v343_v61, %v343_v61  ;;  %v588_v63 = vpop.f32.mrb[5].mxu0 }
 0x4b5   :  { %349 = vst.msk [vmem:[#allocation2] sm:$0x3] %vm348_vm5, %v347_v62 }
 0x4ba   :  { %v480_v0 = vpop.f32.mrb[6].mxu0 }
 0x4bb   :  { %v484_v1 = vpack.c.bf16 %v480_v0, %v480_v0  ;;  %v601_v2 = vpop.f32.mrb[7].mxu0 }
 0x4bd   :  { %486 = vst.msk [vmem:[#allocation2 + $0x2] sm:$0x3] %vm348_vm5, %v484_v1 }
 0x4be   :  { %666 = shalt.err (!%p663_p12)
}
 0x4bf   :  { %s667_s8 = scalar_lea.hbm %s807_s5, 64 }
 0x4c0   :  { %p668_p13 = scmp.ne.s32.totalorder %s807_s5, %s667_s8  ;;  %p671_p0 = scmp.lt.u32.totalorder %s667_s8, %s807_s5 }
 0x4c2   :  { %p673_p1 = pnand %p671_p0, %p668_p13 }
 0x4c4   :  { %676 = shalt.err (!%p673_p1)
}
 0x4c5   :  { %s688_s1 = smov 32   ;;  %s689_s13 = smov 2  }
 0x4c6   :  { %498 = dma.vmem_to_hbm [thread:$0]  %s493_s29, 64, %s807_s5, [#allocation3], %s688_s1, %s688_s1, %s689_s13  }
 0x4c7   :  { %677 = dma.done.wait [#allocation3], 64  }
 0x4c8   :  { %678 = vsyncadd [#allocation3], 4294967232 }
 0x4c9   :  { %679 = dma.done.wait [#allocation5], 128  }
 0x4ca   :  { %680 = vsyncadd [#allocation5], 4294967168 }
 0x4cb   :  { %517 = vsyncpa [#allocation3], 1 }
 0x4cc   :  { %518 = vsyncpa [#allocation5], 1 }

</bundles_post_ra>
